<compile_context>
chip_gen: v6e
topology: v6e:2x2x1
jax: 0.10.0
libtpu: 0.0.40
codegen_flags: <defaults>
</compile_context>

<pallas_src>
import functools
import math

import jax
import jax.numpy as jnp
from jax import lax
from jax.experimental import pallas as pl
from jax.experimental.pallas import tpu as pltpu


# ----------------------------------------------------------------------------
# Fused Pallas kernel
# ----------------------------------------------------------------------------
def _fused_fwd_kernel(x_ref, w1_ref, b1_ref, w2_ref, b2_ref, adj_ref,
                      pml_ref, mon_ref, fwd_ref, s_ref, *, width):
    # x_ref   : (1, 1, cin, blk + 2*width + 2) bf16  halo'd flattened-HW slab
    # w1_ref  : (hidden, 9*cin)                bf16  conv taps, column order (kh, kw, cin)
    # b1_ref  : (hidden, 1)                    f32
    # w2_ref  : (2, hidden)                    bf16
    # b2_ref  : (2, 1)                         f32
    # adj_ref : (1, 2, blk)                    f32   adjoint-seed field
    # pml_ref : (1, blk)                       f32
    # mon_ref : (n_mon, blk)                   f32   monitor-slice masks
    # fwd_ref : (1, 2, blk)                    f32   blended total field (lane-dense)
    # s_ref   : (1, 1, n_mon, 2)               f32   per-block partial s-params
    blk = fwd_ref.shape[-1]

    # Column index of each lane; blk is a multiple of `width`, so it is block
    # independent.  Edge masks built in-kernel (no HBM mask array).
    col = lax.broadcasted_iota(jnp.int32, (1, blk), 1) % width
    has_left = col != 0               # (w-1) tap lies inside the image
    has_right = col != (width - 1)    # (w+1) tap lies inside the image

    # Build the (27, blk) im2col operand from the halo'd slab with static lane
    # slices (offset dh*width + dw), in f32, then cast once to bf16 for the
    # single K=27 MXU pass.
    xa = x_ref[0, 0].astype(jnp.float32)               # (cin, blk + 2*width + 2)
    slabs = []
    for dh in range(3):
        for dw in range(3):
            off = dh * width + dw
            s = xa[:, off:off + blk]                   # value at (r+dh-1, w+dw-1)
            if dw == 0:
                s = jnp.where(has_left, s, 0.0)
            elif dw == 2:
                s = jnp.where(has_right, s, 0.0)
            slabs.append(s)
    xk = jnp.concatenate(slabs, axis=0).astype(jnp.bfloat16)       # (27, blk)

    # 3x3 conv (cin -> hidden): ONE K=27 bf16 matmul, f32 accumulation + tanh.
    acc = jnp.dot(w1_ref[...], xk, preferred_element_type=jnp.float32)
    hid = jnp.tanh(acc + b1_ref[...])                              # (hidden, blk)

    # 1x1 conv (hidden -> 2) in bf16 on the MXU: predicted Ez (real, imag).
    ez = jnp.dot(w2_ref[...], hid.astype(jnp.bfloat16),
                 preferred_element_type=jnp.float32) + b2_ref[...]  # (2, blk)

    # Total-field blend through the pml mask (lane-dense f32 store).
    pml = pml_ref[...]                                             # (1, blk)
    fwd_ref[0] = pml * ez + (1.0 - pml) * adj_ref[0]

    # Per-block partial s-params: VPU multiply + lane reduction (off the MXU).
    mon = mon_ref[...]                                             # (n_mon, blk)
    parts = [jnp.sum(mon * ez[c:c + 1, :], axis=-1, keepdims=True)
             for c in range(2)]
    s_ref[0, 0] = jnp.concatenate(parts, axis=-1)                  # (n_mon, 2)


# ----------------------------------------------------------------------------
# JAX wrapper (parameter setup, layout plumbing, pallas_call)
# ----------------------------------------------------------------------------
def init_params(key, cin=3, hidden=32, cout=2):
    k1, k2 = jax.random.split(key)
    return {
        "w1": jax.random.normal(k1, (hidden, cin, 3, 3), jnp.float32) * 0.1,
        "b1": jnp.zeros((hidden,), jnp.float32),
        "w2": jax.random.normal(k2, (hidden, cout), jnp.float32) * 0.1,
        "b2": jnp.zeros((cout,), jnp.float32),
    }


def fwd_predictor_forward(params, data, epoch=1, block_hw_target=8192):
    eps = data["eps_map"]                       # (B, 1, H, W)  NCHW
    src = data["src_profile"]                   # (B, 2, H, W)  NCHW
    adj_seed = data["fwd_field"][:, -2:, ...]   # (B, 2, H, W)
    mon = data["monitor_slices"]                # (M, H, W)
    pml = data["pml_mask"]                      # (H, W)

    bsz, _, h, w = eps.shape
    hw = h * w
    hidden = params["b1"].shape[0]

    # Block over the flattened H*W axis: a multiple of 128 (lane rule) and of
    # W (rows never straddle a block, so the +-1 column taps only need edge
    # masks, never cross-block data).
    unit = w * 128 // math.gcd(w, 128)                   # lcm(W, 128)
    hw_unit = pl.cdiv(hw, unit) * unit
    block_hw = min(hw_unit, max(unit, (block_hw_target // unit) * unit))
    assert block_hw % w == 0 and block_hw % 128 == 0     # roll/slice safety
    hw_pad = pl.cdiv(hw, block_hw) * block_hw
    n_blk = hw_pad // block_hw
    halo = w + 1
    blk_len = block_hw + 2 * halo

    # Per-block halo'd flattened input (replaces the old 3x row-shift expansion):
    # x_blk[b, j, c, n] = x_flat[b, c, j*block_hw + n - halo]  (0 outside image).
    x = jnp.concatenate([eps, src], axis=1)              # (B, cin, H, W) f32
    cin = x.shape[1]
    x_ext = jnp.pad(x.reshape(bsz, cin, hw),
                    ((0, 0), (0, 0), (halo, hw_pad - hw + halo)))
    x_blk = jnp.stack(
        [x_ext[:, :, j * block_hw:j * block_hw + blk_len] for j in range(n_blk)],
        axis=1).astype(jnp.bfloat16)                     # (B, n_blk, cin, blk_len)

    pml_flat = jnp.pad(pml.astype(jnp.float32).reshape(1, hw),
                       ((0, 0), (0, hw_pad - hw)))
    mon_flat = jnp.pad(mon.astype(jnp.float32).reshape(-1, hw),
                       ((0, 0), (0, hw_pad - hw)))
    n_mon = mon_flat.shape[0]
    adj_flat = jnp.pad(adj_seed.astype(jnp.float32).reshape(bsz, 2, hw),
                       ((0, 0), (0, 0), (0, hw_pad - hw)))

    # Conv weights: (hidden, 27) with column order (kh, kw, cin), bf16 for MXU.
    w1k = params["w1"].transpose(0, 2, 3, 1).reshape(hidden, 9 * cin)
    w1k = w1k.astype(jnp.bfloat16)
    b1c = params["b1"].reshape(hidden, 1).astype(jnp.float32)
    w2t = params["w2"].T.astype(jnp.bfloat16)            # (2, hidden)
    b2c = params["b2"].reshape(2, 1).astype(jnp.float32)

    kernel = functools.partial(_fused_fwd_kernel, width=w)

    # Grid: hw-blocks outer (pml/monitor tiles are re-used across the inner
    # batch axis), batch inner; both axes "parallel" (s-params are per-block
    # partials, reduced in the wrapper).  Per-step VMEM < 8 MiB at blk=8192,
    # safe for v7x's 64 MiB physical VMEM.
    fwd_flat, s_part = pl.pallas_call(
        kernel,
        out_shape=(
            jax.ShapeDtypeStruct((bsz, 2, hw_pad), jnp.float32),
            jax.ShapeDtypeStruct((bsz, n_blk, n_mon, 2), jnp.float32),
        ),
        grid_spec=pltpu.PrefetchScalarGridSpec(
            num_scalar_prefetch=0,
            grid=(n_blk, bsz),
            in_specs=[
                pl.BlockSpec((1, 1, cin, blk_len), lambda j, b: (b, j, 0, 0)),
                pl.BlockSpec((hidden, 9 * cin), lambda j, b: (0, 0)),
                pl.BlockSpec((hidden, 1), lambda j, b: (0, 0)),
                pl.BlockSpec((2, hidden), lambda j, b: (0, 0)),
                pl.BlockSpec((2, 1), lambda j, b: (0, 0)),
                pl.BlockSpec((1, 2, block_hw), lambda j, b: (b, 0, j)),
                pl.BlockSpec((1, block_hw), lambda j, b: (0, j)),
                pl.BlockSpec((n_mon, block_hw), lambda j, b: (0, j)),
            ],
            out_specs=[
                pl.BlockSpec((1, 2, block_hw), lambda j, b: (b, 0, j)),
                pl.BlockSpec((1, 1, n_mon, 2), lambda j, b: (b, j, 0, 0)),
            ],
        ),
        compiler_params=pltpu.CompilerParams(
            dimension_semantics=("parallel", "parallel"),
            vmem_limit_bytes=32 * 1024 * 1024,
        ),
    )(x_blk, w1k, b1c, w2t, b2c, adj_flat, pml_flat, mon_flat)

    fwd_field = fwd_flat[:, :, :hw].reshape(bsz, 2, h, w)
    s_params = s_part.sum(axis=1)                         # (B, n_mon, 2)
    return {
        "forward_field": fwd_field,
        "s_params": s_params,
        "adjoint_field": None,
        "adjoint_source": None,
    }


# ----------------------------------------------------------------------------
# Pure-JAX reference (matching bf16 casts) for a correctness check
# ----------------------------------------------------------------------------
def _reference_forward(params, data):
    eps = data["eps_map"]
    src = data["src_profile"]
    x = jnp.concatenate([eps, src], axis=1)
    xb = x.astype(jnp.bfloat16).astype(jnp.float32)
    w1b = params["w1"].astype(jnp.bfloat16).astype(jnp.float32)
    hid = jnp.tanh(
        lax.conv_general_dilated(xb, w1b, (1, 1), "SAME",
                                 dimension_numbers=("NCHW", "OIHW", "NCHW"))
        + params["b1"][None, :, None, None])
    hb = hid.astype(jnp.bfloat16).astype(jnp.float32)
    w2b = params["w2"].astype(jnp.bfloat16).astype(jnp.float32)
    ez = jnp.einsum("bchw,co->bohw", hb, w2b) + params["b2"][None, :, None, None]
    pml = data["pml_mask"][None, None]
    adj = data["fwd_field"][:, -2:]
    fwd = pml * ez + (1.0 - pml) * adj
    s = jnp.einsum("mhw,bohw->bmo",
                   data["monitor_slices"].astype(jnp.float32), ez)
    return fwd, s


# ----------------------------------------------------------------------------
# main
# ----------------------------------------------------------------------------
if __name__ == "__main__":
    B, H, W, M = 2, 16, 16, 3
    key = jax.random.PRNGKey(0)
    k_eps, k_src, k_fwd, k_par = jax.random.split(key, 4)

    params = init_params(k_par)

    eps_map = 1.0 + 11.0 * jax.random.uniform(k_eps, (B, 1, H, W), jnp.float32)
    src_profile = jax.random.normal(k_src, (B, 2, H, W), jnp.float32)
    fwd_field_in = jax.random.normal(k_fwd, (B, 4, H, W), jnp.float32)

    # Three column-band monitor masks.
    monitor_slices = jnp.zeros((M, H, W), jnp.float32)
    monitor_slices = monitor_slices.at[0, :, 2].set(1.0)
    monitor_slices = monitor_slices.at[1, :, W // 2].set(1.0)
    monitor_slices = monitor_slices.at[2, :, W - 3].set(1.0)

    # PML mask: zero on a 2-pixel border, one in the interior.
    pml_mask = jnp.zeros((H, W), jnp.float32)
    pml_mask = pml_mask.at[2:-2, 2:-2].set(1.0)

    data = {
        "eps_map": eps_map,
        "src_profile": src_profile,
        "fwd_field": fwd_field_in,
        "monitor_slices": monitor_slices,
        "pml_mask": pml_mask,
        "wavelength": jnp.float32(1.55),
        "mode": 1,
        "temp": jnp.float32(300.0),
        "input_slice": "in_slice_1",
        "ht_m": None,          # TODO(synk): mode-overlap tables not modeled
        "et_m": None,
        "opt_cfg_file_path": None,
    }

    out = fwd_predictor_forward(params, data)
    jax.block_until_ready(out["forward_field"])
    jax.block_until_ready(out["s_params"])

    assert out["forward_field"].shape == (B, 2, H, W)
    assert out["s_params"].shape == (B, M, 2)
    assert out["adjoint_field"] is None and out["adjoint_source"] is None

    # Numerical check against the pure-JAX reference (same bf16 rounding).
    fwd_expect, s_expect = _reference_forward(params, data)
    assert jnp.allclose(out["forward_field"], fwd_expect, rtol=5e-2, atol=5e-2)
    assert jnp.allclose(out["s_params"], s_expect, rtol=5e-2, atol=1e-1)

    print("KERNEL_OK")
</pallas_src>

<mosaic_0001>
module attributes {stable_mosaic.version = 11 : i64} {
  func.func @_fused_fwd_kernel(%arg0: i32, %arg1: i32, %arg2: memref<1x1x3x290xbf16, #tpu.memory_space<vmem>>, %arg3: memref<32x27xbf16, #tpu.memory_space<vmem>>, %arg4: memref<32x1xf32, #tpu.memory_space<vmem>>, %arg5: memref<2x32xbf16, #tpu.memory_space<vmem>>, %arg6: memref<2x1xf32, #tpu.memory_space<vmem>>, %arg7: memref<1x2x256xf32, #tpu.memory_space<vmem>>, %arg8: memref<1x256xf32, #tpu.memory_space<vmem>>, %arg9: memref<3x256xf32, #tpu.memory_space<vmem>>, %arg10: memref<1x2x256xf32, #tpu.memory_space<vmem>>, %arg11: memref<1x1x3x2xf32, #tpu.memory_space<vmem>>) attributes {dimension_semantics = [#tpu.dimension_semantics<parallel>, #tpu.dimension_semantics<parallel>], iteration_bounds = array<i64: 1, 2>, scalar_prefetch = 0 : i64, scratch_operands = 0 : i64, tpu.core_type = #tpu.core_type<tc>, window_params = [{transform_indices = @transform_0, window_bounds = array<i64: 1, 1, 3, 290>}, {pipeline_mode = #tpu.pipeline_mode<synchronous>, transform_indices = @transform_1, window_bounds = array<i64: 32, 27>}, {pipeline_mode = #tpu.pipeline_mode<synchronous>, transform_indices = @transform_2, window_bounds = array<i64: 32, 1>}, {pipeline_mode = #tpu.pipeline_mode<synchronous>, transform_indices = @transform_3, window_bounds = array<i64: 2, 32>}, {pipeline_mode = #tpu.pipeline_mode<synchronous>, transform_indices = @transform_4, window_bounds = array<i64: 2, 1>}, {transform_indices = @transform_5, window_bounds = array<i64: 1, 2, 256>}, {transform_indices = @transform_6, window_bounds = array<i64: 1, 256>}, {transform_indices = @transform_7, window_bounds = array<i64: 3, 256>}, {transform_indices = @transform_8, window_bounds = array<i64: 1, 2, 256>}, {transform_indices = @transform_9, window_bounds = array<i64: 1, 1, 3, 2>}]} {
    %0 = tpu.iota {dimensions = array<i32: 1>} : vector<1x256xi32>
    %c16_i32 = arith.constant 16 : i32
    %c0_i32 = arith.constant 0 : i32
    %1 = arith.cmpi eq, %c16_i32, %c0_i32 : i32
    %c1_i32 = arith.constant 1 : i32
    %2 = arith.select %1, %c1_i32, %c16_i32 : i32
    %3 = vector.broadcast %2 : i32 to vector<1x256xi32>
    %4 = arith.remsi %0, %3 : vector<1x256xi32>
    %c0_i32_0 = arith.constant 0 : i32
    %5 = vector.broadcast %c0_i32_0 : i32 to vector<1x256xi32>
    %6 = arith.cmpi ne, %4, %5 : vector<1x256xi32>
    %c0_i32_1 = arith.constant 0 : i32
    %7 = vector.broadcast %c0_i32_1 : i32 to vector<1x256xi32>
    %8 = arith.cmpi slt, %4, %7 : vector<1x256xi32>
    %c0_i32_2 = arith.constant 0 : i32
    %9 = arith.cmpi slt, %2, %c0_i32_2 : i32
    %10 = vector.broadcast %9 : i1 to vector<1x256xi1>
    %11 = vector.broadcast %10 : vector<1x256xi1> to vector<1x256xi1>
    %12 = arith.xori %8, %11 : vector<1x256xi1>
    %13 = arith.andi %12, %6 : vector<1x256xi1>
    %14 = vector.broadcast %2 : i32 to vector<1x256xi32>
    %15 = arith.addi %4, %14 : vector<1x256xi32>
    %16 = arith.select %13, %15, %4 : vector<1x256xi1>, vector<1x256xi32>
    %c0_i32_3 = arith.constant 0 : i32
    %17 = vector.broadcast %c0_i32_3 : i32 to vector<1x256xi32>
    %18 = arith.cmpi ne, %16, %17 : vector<1x256xi32>
    %c15_i32 = arith.constant 15 : i32
    %19 = vector.broadcast %c15_i32 : i32 to vector<1x256xi32>
    %20 = arith.cmpi ne, %16, %19 : vector<1x256xi32>
    %c0 = arith.constant 0 : index
    %c0_4 = arith.constant 0 : index
    %c0_5 = arith.constant 0 : index
    %c0_6 = arith.constant 0 : index
    %21 = vector.load %arg2[%c0, %c0_4, %c0_5, %c0_6] : memref<1x1x3x290xbf16, #tpu.memory_space<vmem>>, vector<1x1x3x290xbf16>
    %22 = vector.shape_cast %21 : vector<1x1x3x290xbf16> to vector<3x290xbf16>
    %23 = arith.extf %22 : vector<3x290xbf16> to vector<3x290xf32>
    %24 = vector.extract_strided_slice %23 {offsets = [0, 0], sizes = [3, 256], strides = [1, 1]} : vector<3x290xf32> to vector<3x256xf32>
    %cst = arith.constant 0.000000e+00 : f32
    %25 = vector.shape_cast %18 : vector<1x256xi1> to vector<1x256xi1>
    %26 = vector.broadcast %25 : vector<1x256xi1> to vector<3x256xi1>
    %27 = vector.broadcast %cst : f32 to vector<3x256xf32>
    %28 = arith.select %26, %24, %27 : vector<3x256xi1>, vector<3x256xf32>
    %29 = vector.extract_strided_slice %23 {offsets = [0, 1], sizes = [3, 256], strides = [1, 1]} : vector<3x290xf32> to vector<3x256xf32>
    %30 = vector.extract_strided_slice %23 {offsets = [0, 2], sizes = [3, 256], strides = [1, 1]} : vector<3x290xf32> to vector<3x256xf32>
    %cst_7 = arith.constant 0.000000e+00 : f32
    %31 = vector.shape_cast %20 : vector<1x256xi1> to vector<1x256xi1>
    %32 = vector.broadcast %31 : vector<1x256xi1> to vector<3x256xi1>
    %33 = vector.broadcast %cst_7 : f32 to vector<3x256xf32>
    %34 = arith.select %32, %30, %33 : vector<3x256xi1>, vector<3x256xf32>
    %35 = vector.extract_strided_slice %23 {offsets = [0, 16], sizes = [3, 256], strides = [1, 1]} : vector<3x290xf32> to vector<3x256xf32>
    %cst_8 = arith.constant 0.000000e+00 : f32
    %36 = vector.shape_cast %18 : vector<1x256xi1> to vector<1x256xi1>
    %37 = vector.broadcast %36 : vector<1x256xi1> to vector<3x256xi1>
    %38 = vector.broadcast %cst_8 : f32 to vector<3x256xf32>
    %39 = arith.select %37, %35, %38 : vector<3x256xi1>, vector<3x256xf32>
    %40 = vector.extract_strided_slice %23 {offsets = [0, 17], sizes = [3, 256], strides = [1, 1]} : vector<3x290xf32> to vector<3x256xf32>
    %41 = vector.extract_strided_slice %23 {offsets = [0, 18], sizes = [3, 256], strides = [1, 1]} : vector<3x290xf32> to vector<3x256xf32>
    %cst_9 = arith.constant 0.000000e+00 : f32
    %42 = vector.shape_cast %20 : vector<1x256xi1> to vector<1x256xi1>
    %43 = vector.broadcast %42 : vector<1x256xi1> to vector<3x256xi1>
    %44 = vector.broadcast %cst_9 : f32 to vector<3x256xf32>
    %45 = arith.select %43, %41, %44 : vector<3x256xi1>, vector<3x256xf32>
    %46 = vector.extract_strided_slice %23 {offsets = [0, 32], sizes = [3, 256], strides = [1, 1]} : vector<3x290xf32> to vector<3x256xf32>
    %cst_10 = arith.constant 0.000000e+00 : f32
    %47 = vector.shape_cast %18 : vector<1x256xi1> to vector<1x256xi1>
    %48 = vector.broadcast %47 : vector<1x256xi1> to vector<3x256xi1>
    %49 = vector.broadcast %cst_10 : f32 to vector<3x256xf32>
    %50 = arith.select %48, %46, %49 : vector<3x256xi1>, vector<3x256xf32>
    %51 = vector.extract_strided_slice %23 {offsets = [0, 33], sizes = [3, 256], strides = [1, 1]} : vector<3x290xf32> to vector<3x256xf32>
    %52 = vector.extract_strided_slice %23 {offsets = [0, 34], sizes = [3, 256], strides = [1, 1]} : vector<3x290xf32> to vector<3x256xf32>
    %cst_11 = arith.constant 0.000000e+00 : f32
    %53 = vector.shape_cast %20 : vector<1x256xi1> to vector<1x256xi1>
    %54 = vector.broadcast %53 : vector<1x256xi1> to vector<3x256xi1>
    %55 = vector.broadcast %cst_11 : f32 to vector<3x256xf32>
    %56 = arith.select %54, %52, %55 : vector<3x256xi1>, vector<3x256xf32>
    %57 = tpu.concatenate %28, %29, %34, %39, %40, %45, %50, %51, %56 in 0 : vector<3x256xf32>, vector<3x256xf32>, vector<3x256xf32>, vector<3x256xf32>, vector<3x256xf32>, vector<3x256xf32>, vector<3x256xf32>, vector<3x256xf32>, vector<3x256xf32> -> vector<27x256xf32>
    %58 = arith.truncf %57 : vector<27x256xf32> to vector<27x256xbf16>
    %c0_12 = arith.constant 0 : index
    %c0_13 = arith.constant 0 : index
    %59 = vector.load %arg3[%c0_12, %c0_13] : memref<32x27xbf16, #tpu.memory_space<vmem>>, vector<32x27xbf16>
    %cst_14 = arith.constant dense<0.000000e+00> : vector<32x256xf32>
    %60 = tpu.matmul %59, %58, %cst_14 {dimension_numbers = #tpu.dot_dimension_numbers<[1], [0], [0], [1], [0, 0, 1, 1], [], []>} : vector<32x27xbf16>, vector<27x256xbf16>, vector<32x256xf32> -> vector<32x256xf32>
    %c0_15 = arith.constant 0 : index
    %c0_16 = arith.constant 0 : index
    %61 = vector.load %arg4[%c0_15, %c0_16] : memref<32x1xf32, #tpu.memory_space<vmem>>, vector<32x1xf32>
    %62 = vector.broadcast %61 : vector<32x1xf32> to vector<32x256xf32>
    %63 = arith.addf %60, %62 : vector<32x256xf32>
    %64 = math.tanh %63 : vector<32x256xf32>
    %c0_17 = arith.constant 0 : index
    %c0_18 = arith.constant 0 : index
    %65 = vector.load %arg5[%c0_17, %c0_18] : memref<2x32xbf16, #tpu.memory_space<vmem>>, vector<2x32xbf16>
    %66 = arith.truncf %64 : vector<32x256xf32> to vector<32x256xbf16>
    %cst_19 = arith.constant dense<0.000000e+00> : vector<2x256xf32>
    %67 = tpu.matmul %65, %66, %cst_19 {dimension_numbers = #tpu.dot_dimension_numbers<[1], [0], [0], [1], [0, 0, 1, 1], [], []>} : vector<2x32xbf16>, vector<32x256xbf16>, vector<2x256xf32> -> vector<2x256xf32>
    %c0_20 = arith.constant 0 : index
    %c0_21 = arith.constant 0 : index
    %68 = vector.load %arg6[%c0_20, %c0_21] : memref<2x1xf32, #tpu.memory_space<vmem>>, vector<2x1xf32>
    %69 = vector.broadcast %68 : vector<2x1xf32> to vector<2x256xf32>
    %70 = arith.addf %67, %69 : vector<2x256xf32>
    %c0_22 = arith.constant 0 : index
    %c0_23 = arith.constant 0 : index
    %71 = vector.load %arg8[%c0_22, %c0_23] : memref<1x256xf32, #tpu.memory_space<vmem>>, vector<1x256xf32>
    %72 = vector.broadcast %71 : vector<1x256xf32> to vector<2x256xf32>
    %73 = arith.mulf %72, %70 : vector<2x256xf32>
    %cst_24 = arith.constant 1.000000e+00 : f32
    %74 = vector.broadcast %cst_24 : f32 to vector<1x256xf32>
    %75 = arith.subf %74, %71 : vector<1x256xf32>
    %c0_25 = arith.constant 0 : index
    %c0_26 = arith.constant 0 : index
    %c0_27 = arith.constant 0 : index
    %76 = vector.load %arg7[%c0_25, %c0_26, %c0_27] : memref<1x2x256xf32, #tpu.memory_space<vmem>>, vector<1x2x256xf32>
    %77 = vector.shape_cast %76 : vector<1x2x256xf32> to vector<2x256xf32>
    %78 = vector.broadcast %75 : vector<1x256xf32> to vector<2x256xf32>
    %79 = arith.mulf %78, %77 : vector<2x256xf32>
    %80 = arith.addf %73, %79 : vector<2x256xf32>
    %c0_28 = arith.constant 0 : index
    %c0_29 = arith.constant 0 : index
    %c0_30 = arith.constant 0 : index
    %81 = vector.load %arg10[%c0_28, %c0_29, %c0_30] : memref<1x2x256xf32, #tpu.memory_space<vmem>>, vector<1x2x256xf32>
    %82 = vector.shape_cast %81 : vector<1x2x256xf32> to vector<2x256xf32>
    %83 = vector.shape_cast %80 : vector<2x256xf32> to vector<1x2x256xf32>
    tpu.vector_store %arg10[%c0_28, %c0_29, %c0_30], %83 {strides = array<i32>} : memref<1x2x256xf32, #tpu.memory_space<vmem>>, vector<1x2x256xf32>,
    %c0_31 = arith.constant 0 : index
    %c0_32 = arith.constant 0 : index
    %84 = vector.load %arg9[%c0_31, %c0_32] : memref<3x256xf32, #tpu.memory_space<vmem>>, vector<3x256xf32>
    %85 = vector.extract_strided_slice %70 {offsets = [0, 0], sizes = [1, 256], strides = [1, 1]} : vector<2x256xf32> to vector<1x256xf32>
    %86 = vector.broadcast %85 : vector<1x256xf32> to vector<3x256xf32>
    %87 = arith.mulf %84, %86 : vector<3x256xf32>
    %cst_33 = arith.constant dense<0.000000e+00> : vector<3xf32>
    %88 = vector.multi_reduction <add>, %87, %cst_33 [1] : vector<3x256xf32> to vector<3xf32>
    %89 = vector.shape_cast %88 : vector<3xf32> to vector<3x1xf32>
    %90 = vector.extract_strided_slice %70 {offsets = [1, 0], sizes = [1, 256], strides = [1, 1]} : vector<2x256xf32> to vector<1x256xf32>
    %91 = vector.broadcast %90 : vector<1x256xf32> to vector<3x256xf32>
    %92 = arith.mulf %84, %91 : vector<3x256xf32>
    %cst_34 = arith.constant dense<0.000000e+00> : vector<3xf32>
    %93 = vector.multi_reduction <add>, %92, %cst_34 [1] : vector<3x256xf32> to vector<3xf32>
    %94 = vector.shape_cast %93 : vector<3xf32> to vector<3x1xf32>
    %95 = tpu.concatenate %89, %94 in 1 : vector<3x1xf32>, vector<3x1xf32> -> vector<3x2xf32>
    %c0_35 = arith.constant 0 : index
    %c0_36 = arith.constant 0 : index
    %c0_37 = arith.constant 0 : index
    %c0_38 = arith.constant 0 : index
    %96 = vector.load %arg11[%c0_35, %c0_36, %c0_37, %c0_38] : memref<1x1x3x2xf32, #tpu.memory_space<vmem>>, vector<1x1x3x2xf32>
    %97 = vector.shape_cast %96 : vector<1x1x3x2xf32> to vector<3x2xf32>
    %98 = vector.shape_cast %95 : vector<3x2xf32> to vector<1x1x3x2xf32>
    tpu.vector_store %arg11[%c0_35, %c0_36, %c0_37, %c0_38], %98 {strides = array<i32>} : memref<1x1x3x2xf32, #tpu.memory_space<vmem>>, vector<1x1x3x2xf32>,
    return
  }
  func.func @transform_0(%arg0: i32, %arg1: i32) -> (i32, i32, i32, i32) {
    %c0_i32 = arith.constant 0 : i32
    %c0_i32_0 = arith.constant 0 : i32
    %c0_i32_1 = arith.constant 0 : i32
    return %arg1, %arg0, %c0_i32, %c0_i32_0 : i32, i32, i32, i32
  }
  func.func @transform_1(%arg0: i32, %arg1: i32) -> (i32, i32) {
    %c0_i32 = arith.constant 0 : i32
    %c0_i32_0 = arith.constant 0 : i32
    %c0_i32_1 = arith.constant 0 : i32
    return %c0_i32, %c0_i32_0 : i32, i32
  }
  func.func @transform_2(%arg0: i32, %arg1: i32) -> (i32, i32) {
    %c0_i32 = arith.constant 0 : i32
    %c0_i32_0 = arith.constant 0 : i32
    %c0_i32_1 = arith.constant 0 : i32
    return %c0_i32, %c0_i32_0 : i32, i32
  }
  func.func @transform_3(%arg0: i32, %arg1: i32) -> (i32, i32) {
    %c0_i32 = arith.constant 0 : i32
    %c0_i32_0 = arith.constant 0 : i32
    %c0_i32_1 = arith.constant 0 : i32
    return %c0_i32, %c0_i32_0 : i32, i32
  }
  func.func @transform_4(%arg0: i32, %arg1: i32) -> (i32, i32) {
    %c0_i32 = arith.constant 0 : i32
    %c0_i32_0 = arith.constant 0 : i32
    %c0_i32_1 = arith.constant 0 : i32
    return %c0_i32, %c0_i32_0 : i32, i32
  }
  func.func @transform_5(%arg0: i32, %arg1: i32) -> (i32, i32, i32) {
    %c0_i32 = arith.constant 0 : i32
    %c0_i32_0 = arith.constant 0 : i32
    return %arg1, %c0_i32, %arg0 : i32, i32, i32
  }
  func.func @transform_6(%arg0: i32, %arg1: i32) -> (i32, i32) {
    %c0_i32 = arith.constant 0 : i32
    %c0_i32_0 = arith.constant 0 : i32
    return %c0_i32, %arg0 : i32, i32
  }
  func.func @transform_7(%arg0: i32, %arg1: i32) -> (i32, i32) {
    %c0_i32 = arith.constant 0 : i32
    %c0_i32_0 = arith.constant 0 : i32
    return %c0_i32, %arg0 : i32, i32
  }
  func.func @transform_8(%arg0: i32, %arg1: i32) -> (i32, i32, i32) {
    %c0_i32 = arith.constant 0 : i32
    %c0_i32_0 = arith.constant 0 : i32
    return %arg1, %c0_i32, %arg0 : i32, i32, i32
  }
  func.func @transform_9(%arg0: i32, %arg1: i32) -> (i32, i32, i32, i32) {
    %c0_i32 = arith.constant 0 : i32
    %c0_i32_0 = arith.constant 0 : i32
    %c0_i32_1 = arith.constant 0 : i32
    return %arg1, %arg0, %c0_i32, %c0_i32_0 : i32, i32, i32, i32
  }
}

</mosaic_0001>

<bundles_post_ra>
// kernel: tpu_custom_call.1
= control target key start
LH: loop header
LB: loop body
LE: loop exit
PB: predicated region body
PF: predicated region fallthrough
CT: control target
= control target key end

     0   :  { %s1653_s0 = inlined_call_operand.vmem [shape: bf16[2,1,3,290], index: 0, kind: input, shape index: {}]   ;;  %s1654_s1 = inlined_call_operand.vmem [shape: bf16[32,27], index: 1, kind: input, shape index: {}]   ;;  %s1655_s2 = inlined_call_operand.vmem [shape: f32[32,1], index: 2, kind: input, shape index: {}]   ;;  %s1656_s3 = inlined_call_operand.vmem [shape: bf16[2,32], index: 3, kind: input, shape index: {}]   ;;  %s1657_s4 = inlined_call_operand.vmem [shape: f32[2,1], index: 4, kind: input, shape index: {}]   ;;  %s1658_s5 = inlined_call_operand.vmem [shape: f32[2,2,256], index: 5, kind: input, shape index: {}]   ;;  %s1659_s6 = inlined_call_operand.vmem [shape: f32[1,256], index: 6, kind: input, shape index: {}]   ;;  %s1660_s7 = inlined_call_operand.vmem [shape: f32[3,256], index: 7, kind: input, shape index: {}]   ;;  %s1661_s8 = inlined_call_operand.hbm [shape: f32[2,2,256], index: 8, kind: output, shape index: {0}]   ;;  %s1662_s9 = inlined_call_operand.vmem [shape: f32[2,1,3,2], index: 9, kind: output, shape index: {1}]  }
   0x1   :  { %1664 = sst [smem:[#allocation5_spill]] %s1653_s0 }
   0x2   :  { %1665 = sst [smem:[#allocation6_spill]] %s1654_s1 }
   0x3   :  { %15 = vsyncpa [#allocation3], 0 }
   0x4   :  { %17 = vsyncpa [#allocation3 + $0x1], 0  ;;  %s1404_s30 = smov 0   ;;  %s1406_s10 = smov 0  }
   0x5   :  { %s1408_s11 = smov 0   ;;  %s1410_s12 = smov 0  }
   0x6   :  { %s1412_s13 = smov 0   ;;  %s1414_s14 = smov 0  }
   0x7 LB: > { %s1113_s15 = sadd.s32 4294967295, %s1341_s14   ;;  %s1114_s16 = sadd.s32 4294967294, %s1341_s14   ;;  %s1341_s14 = sphi %s1414_s14, %s23_s14   ;;  %s1337_s13 = sphi %s1412_s13, %s1683_s13   ;;  %s1333_s12 = sphi %s1410_s12, %s1682_s12   ;;  %s1329_s11 = sphi %s1408_s11, %s1681_s11   ;;  %s1325_s10 = sphi %s1406_s10, %s1680_s10   ;;  %s1321_s30 = sphi %s1404_s30, %s1679_s30  }
   0x8   : > { %s32_s17 = sadd.s32 1, %s1337_s13  ;;  %s236_s18 = sadd.s32 1, %s1329_s11 }
   0x9   : > { %p33_p0 = scmp.ge.s32.totalorder %s32_s17, 2  ;;  %p246_p1 = scmp.ne.s32.totalorder %s1329_s11, %s1325_s10 }
   0xa   : > { %p247_p2 = scmp.eq.s32.totalorder %s1113_s15, 1  ;;  %p252_p3 = scmp.ne.s32.totalorder %s1325_s10, %s1321_s30 }
   0xb   : > { %s1685_s17 = smov (%p33_p0, %s32_s17), 0  ;;  %p253_p5 = scmp.eq.s32.totalorder %s1114_s16, 1 }
   0xc   : > { %p1444_p4 = por %p247_p2, %p246_p1  ;;  %s231_s20 = ssub.s32 %s1337_s13, %s1685_s17 }
   0xd   : > { %p1119_p6 = scmp.ge.s32.totalorder %s1341_s14, 1  ;;  %p234_p7 = scmp.eq.s32.totalorder %s231_s20, 0 }
   0xe   : > { %p1451_p8 = por %p253_p5, %p252_p3  ;;  %p353_p9 = scmp.lt.s32.totalorder %s1341_s14, 3 }
   0xf   : > { %s1457_s22 = scalar_select %p234_p7, %s1329_s11, %s236_s18  }
  0x10   : > { %p354_p10 = pnand %p1119_p6, %p353_p9 }
  0x11   : > { %p418_p11 = scmp.lt.s32.totalorder (!%p354_p10), %s1333_s12, 1  ;;  %s1668_s0 = sld [smem:[#allocation5_spill]] (!%p354_p10) }
  0x12   : > { %357 = sbr.rel (%p354_p10) target bundleno = 767 (0x2ff), region = 52  ;;  %s1343_s28 = smov (!%p354_p10), 110  }
  0x13   : > { %s1344_s29 = smov (!%p354_p10), 96   ;;  %s1345_s15 = smov (!%p354_p10), 112  }
  0x14   : > { %s1346_s16 = smov (!%p354_p10), 94   ;;  %s1347_s18 = smov (!%p354_p10), 95  }
  0x15   : > { %s1348_s20 = smov (!%p354_p10), 126   ;;  %s1351_s25 = smov (!%p354_p10), 127  }
  0x16   : > { %s1677_s1 = sld [smem:[#allocation6_spill]] (!%p354_p10) }
  0x17   : > { %s1461_s23 = scalar_select %p418_p11, %s1333_s12, 1  ;;  %v1350_v15 = vmov 0   ;;  %v667_v17 = vld [vmem:[%s1655_s2 + $0x18] sm:$0xff]  ;;  %v666_v18 = vld [vmem:[%s1655_s2 + $0x10] sm:$0xff]  ;;  %v664_v19 = vld [vmem:[%s1655_s2] sm:$0xff]  ;;  %v457_v22 = vlaneseq  ;;  %vm537_vm0 = vcmask 900096  }
  0x18   : > { %745 = vmatprep.mubr.bf16.mxu0 %v1350_v15  ;;  %1246 = vset.pattern.permute.xlu1 %v1350_v15  ;;  %v665_v20 = vld [vmem:[%s1655_s2 + $0x8] sm:$0xff]  ;;  %v779_v21 = vld [vmem:[%s1657_s4] sm:$0x3]  ;;  %vm550_vm3 = vcmask 785408   ;;  %vm653_vm4 = vcmask 1044480   ;;  %vm630_vm7 = vcmask 777216  }
  0x19   : > { %s1139_s24 = smul.u32 6, %s1461_s23  ;;  %1245 = vset.pattern.permute.xlu0 %v1350_v15  ;;  %821 = vmatprep.mubr.bf16.mxu1 %v1350_v15  ;;  %v458_v23 = vand.u32 127, %v457_v22  ;;  %vm650_vm8 = vcmask 1041408   ;;  %vm563_vm9 = vcmask 769024   ;;  %vm638_vm10 = vcmask 1045504  }
  0x1a   : > { %v1352_v49 = vmov 65535   ;;  %vm524_vm11 = vcmask 916480   ;;  %vm511_vm12 = vcmask 1031168   ;;  %vm604_vm13 = vcmask 908288  }
  0x1b   : > { %s426_s27 = scalar_lea.vmem %s1668_s0, %s1139_s24  ;;  %s1349_s24 = smov 111   ;;  %v459_v24 = vadd.s32 128, %v458_v23  ;;  %v464_v31 = vand.u32 15, %v458_v23  ;;  %v705_v50 = vsel %vm653_vm4, 4294967295, %v1352_v49  ;;  %vm641_vm14 = vcmask 1040384  }
  0x1c   : > { %v488_v0 = vld [vmem:[%s426_s27] sm:$0x3f]  ;;  %v706_v60 = vsel %vm638_vm10, %v705_v50, 0  ;;  %vm644_vm15 = vcmask 1043456  }
  0x1d   : > { %v1467_v1 = vunpack.c.l.bf16 %v488_v0  ;;  %v490_v2 = vunpack.c.h.bf16 %v488_v0  ;;  %v471_v26 = vand.u32 15, %v459_v24  ;;  %vm1517_vm5 = vcmp.ne.s32.totalorder %v464_v31, 0 }
  0x1e   : > { %vm1521_vm6 = vcmp.ne.s32.totalorder %v464_v31, 15 }
  0x1f   : > { %531 = vrot.lane.b32.xlu1 %v1467_v1, %s1343_s28  ;;  %v1472_v3 = vcombine.high %v1467_v1, %v1467_v1  ;;  %v623_v6 = vrot.slane %v490_v2, 3  ;;  %v621_v8 = vrot.slane %v1467_v1, 3  ;;  %v597_v9 = vcombine.low %v490_v2, %v490_v2 }
  0x20   : > { %v572_v12 = vrot.slane %v490_v2, 5  ;;  %v596_v13 = vcombine.low %v1467_v1, %v1467_v1  ;;  %v570_v16 = vrot.slane %v1467_v1, 5  ;;  %vm1506_vm1 = vcmp.ne.s32.totalorder %v471_v26, 15 }
  0x21   : > { %v1205_v4 = vpack.i.bf16 %v490_v2, %v1472_v3  ;;  %v622_v5 = vrot.slane %v1472_v3, 3  ;;  %v1240_v10 = vpack.i.bf16 %v597_v9, %v1467_v1  ;;  %v571_v11 = vrot.slane %v1472_v3, 5 }
  0x22   : > { %vm1511_vm2 = vcmp.ne.s32.totalorder %v471_v26, 0 }
  0x23   : > { %544 = vrot.lane.b32.xlu1 %v1467_v1, %s1344_s29  ;;  %1206 = vrot.lane.b32.xlu0 %v1205_v4, %s1343_s28  ;;  %v1230_v7 = vpack.i.bf16 %v623_v6, %v622_v5  ;;  %v1235_v14 = vpack.i.bf16 %v572_v12, %v571_v11  ;;  %s406_s28 = sand.u32 1, %s1325_s10  }
  0x27   : > { %1226 = vrot.lane.b32.xlu1 %v1205_v4, %s1345_s15  ;;  %1211 = vrot.lane.b32.xlu0 %v1205_v4, %s1344_s29  ;;  %s1120_s29 = sshll.u32 %s406_s28, 2 }
  0x2b   : > { %1216 = vrot.lane.b32.xlu0 %v1205_v4, %s1346_s16  ;;  %1231 = vrot.lane.b32.xlu1 %v1230_v7, %s1347_s18 }
  0x2f   : > { %1221 = vrot.lane.b32.xlu0 %v1205_v4, %s1348_s20  ;;  %624 = vrot.lane.b32.xlu1 %v621_v8, %s1347_s18  ;;  %s1663_s18 = sshll.u32 %s1461_s23, 2 }
  0x30   : > { %s435_s27 = scalar_lea.vmem %s1658_s5, %s1663_s18  ;;  %s1353_s18 = smov [#allocation2]  }
  0x31   : > { %s1269_s0 = sshll.u32 %s1353_s18, 4  ;;  %s1270_s0 = int_to_ptr.vmem [resolvable:$false] %s1269_s0 }
  0x33   : > { %557 = vrot.lane.b32.xlu0 %v1467_v1, %s1346_s16  ;;  %518 = vrot.lane.b32.xlu1 %v1467_v1, %s1345_s15  ;;  %s932_s15 = scalar_lea.sflag [#allocation3], %s406_s28 }
  0x37   : > { %505 = vrot.lane.b32.xlu0 %v1467_v1, %s1348_s20  ;;  %1241 = vrot.lane.b32.xlu1 %v1240_v10, %s1349_s24  ;;  %s408_s20 = scalar_lea.vmem [#allocation2], %s1120_s29 }
  0x3b   : > { %598 = vrot.lane.b32.xlu1 %v596_v13, %s1349_s24  ;;  %1236 = vrot.lane.b32.xlu0 %v1235_v14, %s1351_s25  ;;  %s1138_s24 = sshll.u32 %s1333_s12, 6 }
  0x3c   : > { %s953_s29 = scalar_lea.hbm %s1661_s8, %s1138_s24 }
  0x3f   : > { %573 = vrot.lane.b32.xlu0 %v570_v16, %s1351_s25  ;;  %685 = vperm.xlu1 %1246, %v667_v17   ;;  %s955_s25 = sshll.u32 %s408_s20, 4  ;;  %s956_s25 = int_to_ptr.vmem [resolvable:$true] %s955_s25 }
  0x40   : > { %s1265_s16 = scalar_lea.vmem %s956_s25, 64  ;;  %p1272_p1 = scmp.lt.s32.totalorder %s956_s25, %s1270_s0 }
  0x41   : > { %p1266_p12 = scmp.ne.s32.totalorder %s956_s25, %s1265_s16 }
  0x43   : > { %680 = vperm.xlu0 %1245, %v666_v18   ;;  %670 = vperm.xlu1 %1246, %v664_v19   ;;  %p1267_p13 = pnand %p1266_p12, %p1444_p4 }
  0x45   : > { %p1268_p0 = pneg %p1267_p13 }
  0x47   : > { %675 = vperm.xlu0 %1245, %v665_v20   ;;  %782 = vperm.xlu1 %1246, %v779_v21  }
  0x91   : > { %v532_v25 = vpop.permute.xlu1 %531 }
  0x95   : > { %v545_v27 = vpop.permute.xlu1 %544  ;;  %v1207_v28 = vpop.permute.xlu0 %1206 }
  0x96   : > { %v1209_v29 = vunpack.i.h.bf16 %v1207_v28  ;;  %v1208_v30 = vunpack.i.l.bf16 %v1207_v28 }
  0x98   : > { %v539_v33 = vsel %vm537_vm0, %v1208_v30, %v1209_v29  ;;  %v538_v44 = vsel %vm537_vm0, %v532_v25, %v1208_v30  ;;  %vm579_vm0 = vcmask 1039360  }
  0x99   : > { %v1227_v34 = vpop.permute.xlu1 %1226  ;;  %v1212_v36 = vpop.permute.xlu0 %1211  ;;  %v543_v39 = vsel %vm1506_vm1, %v539_v33, 0.0  ;;  %v542_v57 = vsel %vm1521_vm6, %v538_v44, 0.0 }
  0x9a   : > { %v1214_v37 = vunpack.i.h.bf16 %v1212_v36  ;;  %v1213_v38 = vunpack.i.l.bf16 %v1212_v36  ;;  %v1528_v48 = vrot.slane %v543_v39, 1  ;;  %v1229_v61 = vunpack.i.h.bf16 %v1227_v34 }
  0x9b   : > { %v1228_v62 = vunpack.i.l.bf16 %v1227_v34  ;;  %v611_v10 = vrot.slane %v542_v57, 1 }
  0x9c   : > { %v551_v42 = vsel %vm550_vm3, %v545_v27, %v1213_v38  ;;  %v552_v43 = vsel %vm550_vm3, %v1213_v38, %v1214_v37  ;;  %vm647_vm3 = vcmask 1046528  }
  0x9d   : > { %v556_v45 = vsel %vm1511_vm2, %v552_v43, 0.0  ;;  %v1217_v46 = vpop.permute.xlu0 %1216  ;;  %v1232_v47 = vpop.permute.xlu1 %1231  ;;  %v555_v56 = vsel %vm1517_vm5, %v551_v42, 0.0  ;;  %v526_v14 = vsel %vm524_vm11, %v1228_v62, %v1229_v61 }
  0x9e   : > { %v618_v51 = vrot.slane %v556_v45, 6  ;;  %v1219_v52 = vunpack.i.h.bf16 %v1217_v46  ;;  %v1218_v53 = vunpack.i.l.bf16 %v1217_v46  ;;  %v1234_v54 = vunpack.i.h.bf16 %v1232_v47 }
  0x9f   : > { %v1233_v55 = vunpack.i.l.bf16 %v1232_v47  ;;  %v617_v7 = vrot.slane %v555_v56, 6  ;;  %v530_v25 = vsel %vm1511_vm2, %v526_v14, 0.0  ;;  %v499_v45 = vsel %vm1511_vm2, %v1472_v3, 0.0 }
  0xa0   : > { %v565_v58 = vsel %vm563_vm9, %v1218_v53, %v1219_v52  ;;  %v652_v59 = vsel %vm650_vm8, %v1528_v48, %v618_v51  ;;  %v593_v36 = vrot.slane %v530_v25, 7  ;;  %v498_v52 = vsel %vm1517_vm5, %v1467_v1, 0.0  ;;  %v1247_v1 = vld [vmem:[%s1677_s1] sm:$0xff]  }
  0xa1   : > { %v1222_v63 = vpop.permute.xlu0 %1221  ;;  %v625_v0 = vpop.permute.xlu1 %624  ;;  %v569_v2 = vsel %vm1506_vm1, %v565_v58, 0.0  ;;  %v632_v4 = vsel %vm630_vm7, %v1233_v55, %v1234_v54  ;;  %v651_v18 = vsel %vm650_vm8, %v611_v10, %v617_v7  ;;  %vm698_vm2 = vcmask 220160  }
  0xa2   : > { %v1224_v5 = vunpack.i.h.bf16 %v1222_v63  ;;  %v1223_v6 = vunpack.i.l.bf16 %v1222_v63  ;;  %v655_v8 = vsel %vm653_vm4, %v652_v59, %v632_v4  ;;  %v631_v11 = vsel %vm630_vm7, %v625_v0, %v1233_v55 }
  0xa3   : > { %v659_v9 = vpack.c.bf16 %v569_v2, %v655_v8  ;;  %v654_v23 = vsel %vm653_vm4, %v651_v18, %v631_v11  ;;  %vm785_vm4 = vcmask 261120  }
  0xa4   : > { %v513_v12 = vsel %vm511_vm12, %v1223_v6, %v1224_v5 }
  0xa5   : > { %v558_v13 = vpop.permute.xlu0 %557  ;;  %v519_v16 = vpop.permute.xlu1 %518  ;;  %v711_v17 = vand.u32 %v706_v60, %v659_v9  ;;  %v517_v21 = vsel %vm1506_vm1, %v513_v12, 0.0  ;;  %vm635_vm1 = vcmask 1042432  }
  0xa6   : > { %v564_v19 = vsel %vm563_vm9, %v558_v13, %v1218_v53  ;;  %v525_v20 = vsel %vm524_vm11, %v519_v16, %v1228_v62  ;;  %v587_v29 = vrot.slane %v517_v21, 2 }
  0xa7   : > { %v568_v24 = vsel %vm1521_vm6, %v564_v19, 0.0  ;;  %725 = vmatprep.subr.bf16.mxu0 %v711_v17  ;;  %v529_v27 = vsel %vm1517_vm5, %v525_v20, 0.0 }
  0xa8   : > { %v658_v26 = vpack.c.bf16 %v568_v24, %v654_v23  ;;  %v592_v38 = vrot.slane %v529_v27, 7  ;;  %v643_v46 = vsel %vm641_vm14, %v587_v29, %v593_v36  ;;  %v830_v36 = vld [vmem:[%s1659_s6] sm:$0x3] }
  0xa9   : > { %v506_v28 = vpop.permute.xlu0 %505  ;;  %v1242_v30 = vpop.permute.xlu1 %1241 }
  0xaa   : > { %v512_v31 = vsel %vm511_vm12, %v506_v28, %v1223_v6  ;;  %v1244_v32 = vunpack.i.h.bf16 %v1242_v30  ;;  %v1243_v33 = vunpack.i.l.bf16 %v1242_v30  ;;  %v708_v34 = vand.u32 %v706_v60, %v658_v26 }
  0xab   : > { %v516_v37 = vsel %vm1521_vm6, %v512_v31, 0.0 }
  0xac   : > { %v586_v39 = vrot.slane %v516_v37, 2  ;;  %726 = vmatpush1.bf16.msra.mxu0 %v708_v34  ;;  %v606_v42 = vsel %vm604_vm13, %v1243_v33, %v1244_v32  ;;  %v833_v34 = vshrl.u32 %v457_v22, 7 }
  0xad   : > { %v599_v43 = vpop.permute.xlu1 %598  ;;  %v1237_v44 = vpop.permute.xlu0 %1236  ;;  %v646_v51 = vsel %vm644_vm15, %v643_v46, %v606_v42  ;;  %v1130_v42 = vld.sshfl [vmem:[%s435_s27] sm:$0x33 pattern:$0x76325410] }
  0xae   : > { %v642_v47 = vsel %vm641_vm14, %v586_v39, %v592_v38  ;;  %v605_v41 = vsel %vm604_vm13, %v599_v43, %v1243_v33  ;;  %v1239_v49 = vunpack.i.h.bf16 %v1237_v44  ;;  %v1238_v50 = vunpack.i.l.bf16 %v1237_v44  ;;  %v774_v33 = vld [vmem:[%s1656_s3] sm:$0x1] }
  0xaf   : > { %v645_v54 = vsel %vm644_vm15, %v642_v47, %v605_v41  ;;  %v649_v57 = vsel %vm647_vm3, %v646_v51, %v1528_v48  ;;  %v1248_v48 = vld [vmem:[%s1677_s1 + $0x8] sm:$0xff]   ;;  %v834_v37 = vsub.s32 0, %v833_v34  ;;  %v838_v38 = vsub.s32 1, %v833_v34  ;;  %s1271_s1 = scalar_lea.vmem %s1270_s0, 128 }
  0xb0   : > { %v581_v53 = vsel %vm579_vm0, %v1238_v50, %v1239_v49  ;;  %v648_v61 = vsel %vm647_vm3, %v645_v54, %v611_v10  ;;  %v865_v46 = vcombine.high %v1130_v42, %v1130_v42  ;;  %p1273_p2 = scmp.lt.s32.totalorder %s1271_s1, %s1265_s16 }
  0xb1   : > { %v574_v35 = vpop.permute.xlu0 %573  ;;  %v637_v3 = vsel %vm635_vm1, %v499_v45, %v581_v53  ;;  %v835_v43 = vrot.slane %v830_v36, %v834_v37  ;;  %v839_v49 = vrot.slane %v830_v36, %v838_v38 }
  0xb2   : > { %v580_v55 = vsel %vm579_vm0, %v574_v35, %v1238_v50  ;;  %v640_v56 = vsel %vm638_vm10, %v637_v3, %v587_v29  ;;  %p1274_p3 = por %p1273_p2, %p1272_p1 }
  0xb3   : > { %v636_v58 = vsel %vm635_vm1, %v498_v52, %v580_v55  ;;  %v657_v59 = vpack.c.bf16 %v649_v57, %v640_v56 }
  0xb4   : > { %v639_v60 = vsel %vm638_vm10, %v636_v58, %v586_v39  ;;  %v844_v39 = vsub.f32 1.0, %v830_v36  ;;  %p1275_p5 = pnand %p1274_p3, %p1268_p0 }
  0xb5   : > { %727 = vmatprep.subr.bf16.mxu0 %v657_v59  ;;  %v656_v40 = vpack.c.bf16 %v648_v61, %v639_v60  ;;  %v884_v60 = vld [vmem:[%s1660_s7] sm:$0x77] }
  0xb6   : > { %v850_v44 = vrot.slane %v844_v39, %v834_v37  ;;  %v854_v45 = vrot.slane %v844_v39, %v838_v38 }
  0xb7   : > { %728 = vmatpush1.bf16.msra.mxu0 %v656_v40 }
  0xb8   : > { %v868_v52 = vmul.f32 %v1130_v42, %v850_v44  ;;  %v869_v54 = vmul.f32 %v865_v46, %v854_v45 }
  0xba   : > { %1127 = vmatmul.mubr.msk.bf16.vlgmr.msra.gmra.mxu0 %vm698_vm2, %v1247_v1  ;;  %v686_v5 = vpop.permute.xlu1 %685 }
  0xbb   : > { %755 = vmatprep.mubr.bf16.mxu0 %v1350_v15 }
  0xbe   : > { %v681_v0 = vpop.permute.xlu0 %680  ;;  %v671_v13 = vpop.permute.xlu1 %670 }
  0xc2   : > { %1128 = vmatmul.mubr.msk.bf16.gmra.mxu0 %vm698_vm2, %v1248_v48  ;;  %v676_v7 = vpop.permute.xlu0 %675  ;;  %v783_v47 = vpop.permute.xlu1 %782 }
 0x17a   : > { %v747_v62 = vpop.f32.mrf.mxu0 }
 0x17b   : > { %v748_v19 = vadd.f32 %v747_v62, %v671_v13 }
 0x17c   : > { %v749_v63 = vpop.f32.mrf.mxu0 }
 0x17d   : > { %v750_v16 = vadd.f32 %v749_v63, %v671_v13 }
 0x17e   : > { %v751_v2 = vpop.f32.mrf.mxu0 }
 0x17f   : > { %v752_v18 = vadd.f32 %v751_v2, %v676_v7 }
 0x180   : > { %v753_v4 = vpop.f32.mrf.mxu0 }
 0x181   : > { %v754_v8 = vadd.f32 %v753_v4, %v676_v7 }
 0x182   : > { %v757_v6 = vpop.f32.mrf.mxu0 }
 0x183   : > { %1249 = vtanh.f32 %v754_v8  ;;  %v758_v15 = vadd.f32 %v757_v6, %v681_v0 }
 0x184   : > { %v759_v9 = vpop.f32.mrf.mxu0 }
 0x185   : > { %v760_v10 = vadd.f32 %v759_v9, %v681_v0 }
 0x186   : > { %v761_v11 = vpop.f32.mrf.mxu0 }
 0x187   : > { %v762_v12 = vadd.f32 %v761_v11, %v686_v5  ;;  %1251 = vtanh.f32 %v760_v10 }
 0x188   : > { %v763_v14 = vpop.f32.mrf.mxu0 }
 0x189   : > { %v764_v17 = vadd.f32 %v763_v14, %v686_v5  ;;  %1253 = vtanh.f32 %v762_v12 }
 0x18b   : > { %1255 = vtanh.f32 %v764_v17 }
 0x18c   : > { %1257 = vtanh.f32 %v758_v15 }
 0x18d   : > { %1259 = vtanh.f32 %v750_v16 }
 0x18e   : > { %1261 = vtanh.f32 %v752_v18 }
 0x18f   : > { %1263 = vtanh.f32 %v748_v19 }
 0x190   : > { %v1250_v20 = vpop.eup %1249 }
 0x194   : > { %v1252_v21 = vpop.eup %1251 }
 0x196   : > { %v1254_v23 = vpop.eup %1253 }
 0x198   : > { %v1256_v24 = vpop.eup %1255 }
 0x199   : > { %v1258_v25 = vpop.eup %1257  ;;  %v778_v26 = vpack.c.bf16 %v1256_v24, %v1252_v21 }
 0x19a   : > { %v1260_v27 = vpop.eup %1259  ;;  %v777_v28 = vpack.c.bf16 %v1254_v23, %v1258_v25 }
 0x19b   : > { %v1262_v29 = vpop.eup %1261  ;;  %801 = vmatprep.subr.bf16.mxu1 %v778_v26  ;;  %v776_v30 = vpack.c.bf16 %v1250_v20, %v1260_v27 }
 0x19c   : > { %802 = vmatpush1.bf16.msra.mxu1 %v777_v28  ;;  %v1264_v31 = vpop.eup %1263 }
 0x19d   : > { %803 = vmatprep.subr.bf16.mxu1 %v776_v30  ;;  %v775_v32 = vpack.c.bf16 %v1262_v29, %v1264_v31 }
 0x1a0   : > { %804 = vmatpush1.bf16.msra.mxu1 %v775_v32 }
 0x1a3   : > { %1129 = vmatmul.mubr.msk.bf16.vlgmr.msra.gmra.mxu1 %vm785_vm4, %v774_v33 }
 0x263   : > { %v823_v22 = vpop.f32.mrf.mxu1 }
 0x264   : > { %v824_v41 = vadd.f32 %v823_v22, %v783_v47 }
 0x265   : > { %v825_v50 = vpop.f32.mrf.mxu1 }
 0x266   : > { %v842_v51 = vmul.f32 %v835_v43, %v824_v41  ;;  %v826_v53 = vadd.f32 %v825_v50, %v783_v47  ;;  %v888_v35 = vrot.slane %v824_v41, %v834_v37  ;;  %v909_v55 = vrot.slane %v824_v41, %v838_v38 }
 0x267   : > { %v827_v3 = vpop.f32.mrf.mxu1 }
 0x268   : > { %v843_v56 = vmul.f32 %v839_v49, %v826_v53  ;;  %v892_v57 = vrot.slane %v826_v53, %v834_v37  ;;  %v913_v58 = vrot.slane %v826_v53, %v838_v38  ;;  %v870_v61 = vadd.f32 %v868_v52, %v842_v51 }
 0x269   : > { %v828_v59 = vpop.f32.mrf.mxu1 }
 0x26a   : > { %v871_v40 = vadd.f32 %v869_v54, %v843_v56  ;;  %v916_v1 = vcombine.low %v909_v55, %v913_v58  ;;  %v895_v48 = vcombine.low %v888_v35, %v892_v57 }
 0x26c   : > { %v918_v62 = vmul.f32 %v916_v1, %v884_v60  ;;  %v897_v63 = vmul.f32 %v895_v48, %v884_v60  ;;  %v874_v0 = vcombine.low %v870_v61, %v871_v40 }
 0x26e   : > { %v920_v2 = vcombine.high %v918_v62, %v918_v62  ;;  %v899_v4 = vcombine.high %v897_v63, %v897_v63  ;;  %1131 = vst.sshfl [vmem:[%s408_s20] sm:$0x33 pattern:$0x76325410] %v874_v0  ;;  %v922_v5 = vsel %vm635_vm1, %v918_v62, 0.0  ;;  %v901_v7 = vsel %vm635_vm1, %v897_v63, 0.0 }
 0x270   : > { %v923_v6 = vsel %vm635_vm1, %v920_v2, 0.0  ;;  %v902_v8 = vsel %vm635_vm1, %v899_v4, 0.0 }
 0x271   : > { %v924_v9 = vadd.f32 %v923_v6, %v922_v5  ;;  %v903_v10 = vadd.f32 %v902_v8, %v901_v7 }
 0x273   : > { %925 = vadd.xlane.f32.xlu1 %v924_v9  ;;  %904 = vadd.xlane.f32.xlu0 %v903_v10 }
 0x274   : > { %1278 = shalt.err (!%p1275_p5)
}
 0x275   : > { %s1279_s12 = scalar_lea.hbm %s953_s29, 64  ;;  %s1283_s24 = scalar_lea.hbm %s1661_s8, 128 }
 0x276   : > { %p1280_p6 = scmp.ne.s32.totalorder %s953_s29, %s1279_s12  ;;  %p1284_p10 = scmp.lt.s32.totalorder %s953_s29, %s1661_s8 }
 0x277   : > { %p1285_p11 = scmp.lt.s32.totalorder %s1283_s24, %s1279_s12 }
 0x278   : > { %p1281_p7 = pnand %p1280_p6, %p1444_p4 }
 0x279   : > { %p1286_p12 = por %p1285_p11, %p1284_p10 }
 0x27a   : > { %p1282_p9 = pneg %p1281_p7 }
 0x27c   : > { %p1287_p13 = pnand %p1286_p12, %p1282_p9 }
 0x27e   : > { %1290 = shalt.err (!%p1287_p13)
}
 0x27f   : > { %1140 = dma.vmem_to_hbm [thread:$0]  (%p1444_p4), %s956_s25, 64, %s953_s29, %s932_s15   ;;  %vm927_vm5 = vcmask 7168   ;;  %vm929_vm6 = vcmask 10240  }
 0x280   : > { %s1678_s0 = sshll.u32 %s1461_s23, 2 }
 0x281   : > { %s455_s16 = scalar_lea.vmem %s1662_s9, %s1678_s0 }
 0x2fc   : > { %v926_v11 = vpop.xlane.xlu1 %925  ;;  %v905_v12 = vpop.xlane.xlu0 %904 }
 0x2fd   : > { %v928_v13 = vsel %vm927_vm5, %v905_v12, %v926_v11 }
 0x2fe   : > { %930 = vst.msk [vmem:[%s455_s16] sm:$0x7] %vm929_vm6, %v928_v13 }
 0x2ff PF: > { %p1146_p0 = scmp.ge.s32.totalorder %s1341_s14, 2  ;;  %s970_s12 = sand.u32 1, %s1321_s30  }
 0x300   : > { %s971_s19 = scalar_lea.sflag [#allocation3], %s970_s12 }
 0x301   : > { %p1143_p1 = pnand %p1146_p0, %p1451_p8 }
 0x303   : > { %p1144_p4 = pneg %p1143_p1 }
 0x305   : > { %1316 = dma.done.wait (%p1144_p4), %s971_s19, 64  }
 0x306   : > { %1318 = vsyncadd (%p1144_p4), %s971_s19, 4294967232  ;;  %s23_s14 = sadd.s32 1, %s1341_s14   ;;  %s1679_s30 = smov %s1325_s10 }
 0x307   : > { %p20_p2 = scmp.ge.s32.totalorder %s23_s14, 4   ;;  %s1680_s10 = smov %s1329_s11 }
 0x308   : > { %s1681_s11 = smov %s1457_s22  ;;  %s1682_s12 = smov %s1337_s13 }
 0x309   : > { %s1683_s13 = smov %s1685_s17  ;;  %22 = sbr.rel (!%p20_p2) target bundleno = 7 (0x7), region = 108 }
 0x30e   :  { %986 = vsyncpa [#allocation3], 1 }
 0x30f   :  { %988 = vsyncpa [#allocation3 + $0x1], 1 }

</bundles_post_ra>
